<compile_context>
chip_gen: v7x
topology: tpu7x:2x2x1
jax: 0.10.0
libtpu: 0.0.40
codegen_flags: <defaults>
</compile_context>

<pallas_src>
import jax
import jax.numpy as jnp
from jax.experimental import pallas as pl
from jax.experimental.pallas import tpu as pltpu


def _conv1x1_kernel(x_ref, w_ref, o_ref):
    # x_ref: (Nb, Cin, ts)   spatial on lanes, channels on sublanes
    # w_ref: (Cout, Cin)     tiny weight, constant block -> VMEM-resident
    # o_ref: (Nb, Cout, ts)  lane-dense output block
    w = w_ref[...]
    nb = x_ref.shape[0]
    for b in range(nb):  # Nb is small & static; each iteration is load->MXU->store
        y = jax.lax.dot_general(
            w, x_ref[b],
            dimension_numbers=(((1,), (0,)), ((), ())),
            preferred_element_type=jnp.float32)
        o_ref[b] = y.astype(o_ref.dtype)


def _largest_divisor_leq(n, cap):
    for d in range(min(n, cap), 0, -1):
        if n % d == 0:
            return d
    return 1


def _pick_spatial_tile(S, per_col_bytes, target_bytes):
    """Spatial tile: multiple of 128 (or full S), sized so ts*per_col ~= target."""
    if S < 128 or S * per_col_bytes <= target_bytes:
        return S
    want = max(128, int(target_bytes // per_col_bytes) // 128 * 128)
    want = min(want, (S // 128) * 128)
    # Prefer a multiple-of-128 divisor of S (unmasked final tile) if it isn't
    # more than ~2x smaller than the target tile.
    if S % 128 == 0:
        q = S // 128
        best = 128
        for d in range(1, q + 1):
            if q % d == 0 and d * 128 <= want:
                best = d * 128
        if best * 2 >= want:
            return best
    return want


def conv1x1_forward(x_nchw, weight, *, target_block_bytes=3 * 1024 * 1024):
    """x_nchw: (N, Cin, H, W); weight: (Cout, Cin, 1, 1) like nn.Conv2d."""
    N, Cin, H, W = x_nchw.shape
    Cout = weight.shape[0]
    S = H * W

    # Native-layout views: NO transposes, only reshapes.
    x = x_nchw.reshape(N, Cin, S)                       # spatial already last
    w = weight.reshape(Cout, Cin).astype(x_nchw.dtype)  # feed MXU in native dtype

    dsize = jnp.dtype(x_nchw.dtype).itemsize
    per_col = (Cin + Cout) * dsize          # in+out bytes per spatial column per image
    per_img = S * per_col

    if per_img >= target_block_bytes or N == 1:
        # Spatial-rich (or single-image) regime: tile the spatial axis.
        Nb = 1
        ts = _pick_spatial_tile(S, per_col, target_block_bytes)
    else:
        # Small-spatial regime (late LPIPS stages): fold several images per step.
        ts = S
        want_nb = max(1, int(target_block_bytes // per_img))
        want_nb = min(want_nb, N, 32)
        Nb = _largest_divisor_leq(N, want_nb)

    grid_n = pl.cdiv(N, Nb)
    grid_s = pl.cdiv(S, ts)

    # v7x has 2 TensorCores: make sure a "parallel" axis has >= 2 steps when possible.
    if grid_n * grid_s == 1:
        if N >= 2:
            Nb = (N + 1) // 2
            grid_n = pl.cdiv(N, Nb)
        elif S >= 256:
            ts = ((pl.cdiv(S, 2) + 127) // 128) * 128
            grid_s = pl.cdiv(S, ts)

    cost = pl.CostEstimate(
        flops=2 * N * S * Cin * Cout,
        transcendentals=0,
        bytes_accessed=N * S * (Cin + Cout) * dsize + Cout * Cin * dsize,
    )

    out = pl.pallas_call(
        _conv1x1_kernel,
        out_shape=jax.ShapeDtypeStruct((N, Cout, S), x_nchw.dtype),
        grid_spec=pltpu.PrefetchScalarGridSpec(
            num_scalar_prefetch=0,
            grid=(grid_n, grid_s),
            in_specs=[
                pl.BlockSpec((Nb, Cin, ts), lambda n, s: (n, 0, s)),
                # Tiny weight, constant block -> stays resident in VMEM.
                pl.BlockSpec((Cout, Cin), lambda n, s: (0, 0)),
            ],
            out_specs=pl.BlockSpec((Nb, Cout, ts), lambda n, s: (n, 0, s)),
        ),
        compiler_params=pltpu.CompilerParams(
            dimension_semantics=("parallel", "parallel"),
        ),
        cost_estimate=cost,
    )(x, w)

    # (N, Cout, S) -> NCHW with a plain reshape (no transpose).
    return out.reshape(N, Cout, H, W)


def _reference(x_nchw, weight):
    # Pure-JAX reference: 1x1 conv == einsum over channels.
    w = weight.reshape(weight.shape[0], weight.shape[1])  # (Cout, Cin)
    return jnp.einsum("nchw,oc->nohw", x_nchw, w)


if __name__ == "__main__":
    key = jax.random.PRNGKey(0)
    kx, kw = jax.random.split(key)

    N, Cin, H, W = 2, 4, 16, 16
    Cout = 1

    x = jax.random.normal(kx, (N, Cin, H, W), dtype=jnp.float32)
    # Deterministic weight init (shape matches nn.Conv2d(in, out, 1) weight: (Cout, Cin, 1, 1)).
    bound = 1.0 / (Cin ** 0.5)
    weight = jax.random.uniform(
        kw, (Cout, Cin, 1, 1), minval=-bound, maxval=bound, dtype=jnp.float32
    )

    y = conv1x1_forward(x, weight)
    y = jax.block_until_ready(y)

    y_ref = _reference(x, weight)
    assert y.shape == (N, Cout, H, W)
    assert jnp.allclose(y, y_ref, atol=1e-5, rtol=1e-5)

    print("KERNEL_OK")
</pallas_src>

<mosaic_0001>
module attributes {stable_mosaic.version = 11 : i64} {
  func.func @_conv1x1_kernel(%arg0: i32, %arg1: i32, %arg2: memref<1x4x256xf32, #tpu.memory_space<vmem>>, %arg3: memref<1x4xf32, #tpu.memory_space<vmem>>, %arg4: memref<1x1x256xf32, #tpu.memory_space<vmem>>) attributes {dimension_semantics = [#tpu.dimension_semantics<parallel>, #tpu.dimension_semantics<parallel>], iteration_bounds = array<i64: 2, 1>, scalar_prefetch = 0 : i64, scratch_operands = 0 : i64, tpu.core_type = #tpu.core_type<tc>, window_params = [{transform_indices = @transform_0, window_bounds = array<i64: 1, 4, 256>}, {pipeline_mode = #tpu.pipeline_mode<synchronous>, transform_indices = @transform_1, window_bounds = array<i64: 1, 4>}, {transform_indices = @transform_2, window_bounds = array<i64: 1, 1, 256>}]} {
    %c0 = arith.constant 0 : index
    %c0_0 = arith.constant 0 : index
    %0 = vector.load %arg3[%c0, %c0_0] : memref<1x4xf32, #tpu.memory_space<vmem>>, vector<1x4xf32>
    %c0_1 = arith.constant 0 : index
    %c0_2 = arith.constant 0 : index
    %c0_3 = arith.constant 0 : index
    %1 = vector.load %arg2[%c0_1, %c0_2, %c0_3] : memref<1x4x256xf32, #tpu.memory_space<vmem>>, vector<1x4x256xf32>
    %2 = vector.shape_cast %1 : vector<1x4x256xf32> to vector<4x256xf32>
    %cst = arith.constant dense<0.000000e+00> : vector<1x256xf32>
    %3 = tpu.matmul %0, %2, %cst {dimension_numbers = #tpu.dot_dimension_numbers<[1], [0], [0], [1], [0, 0, 1, 1], [], []>} : vector<1x4xf32>, vector<4x256xf32>, vector<1x256xf32> -> vector<1x256xf32>
    %c0_4 = arith.constant 0 : index
    %c0_5 = arith.constant 0 : index
    %c0_6 = arith.constant 0 : index
    %4 = vector.load %arg4[%c0_4, %c0_5, %c0_6] : memref<1x1x256xf32, #tpu.memory_space<vmem>>, vector<1x1x256xf32>
    %5 = vector.shape_cast %4 : vector<1x1x256xf32> to vector<1x256xf32>
    %6 = vector.shape_cast %3 : vector<1x256xf32> to vector<1x1x256xf32>
    tpu.vector_store %arg4[%c0_4, %c0_5, %c0_6], %6 {strides = array<i32>} : memref<1x1x256xf32, #tpu.memory_space<vmem>>, vector<1x1x256xf32>,
    return
  }
  func.func @transform_0(%arg0: i32, %arg1: i32) -> (i32, i32, i32) {
    %c0_i32 = arith.constant 0 : i32
    %c0_i32_0 = arith.constant 0 : i32
    return %arg0, %c0_i32, %arg1 : i32, i32, i32
  }
  func.func @transform_1(%arg0: i32, %arg1: i32) -> (i32, i32) {
    %c0_i32 = arith.constant 0 : i32
    %c0_i32_0 = arith.constant 0 : i32
    %c0_i32_1 = arith.constant 0 : i32
    return %c0_i32, %c0_i32_0 : i32, i32
  }
  func.func @transform_2(%arg0: i32, %arg1: i32) -> (i32, i32, i32) {
    %c0_i32 = arith.constant 0 : i32
    %c0_i32_0 = arith.constant 0 : i32
    return %arg0, %c0_i32, %arg1 : i32, i32, i32
  }
}

</mosaic_0001>

<bundles_post_ra>
// kernel: tpu_custom_call.1
= control target key start
LH: loop header
LB: loop body
LE: loop exit
PB: predicated region body
PF: predicated region fallthrough
CT: control target
= control target key end

     0   :  { %7 = vsyncpa [#allocation3], 0  ;;  %s782_s0 = inlined_call_operand.hbm [shape: f32[2,4,256], index: 0, kind: input, shape index: {}]   ;;  %s783_s1 = inlined_call_operand.vmem [shape: f32[1,4], index: 1, kind: input, shape index: {}]   ;;  %s784_s2 = inlined_call_operand.hbm [shape: f32[2,1,256], index: 2, kind: output, shape index: {}]  }
   0x1   :  { %9 = vsyncpa [#allocation3 + $0x1], 0 }
   0x2   :  { %10 = vsyncpa [#allocation4], 0 }
   0x3   :  { %12 = vsyncpa [#allocation4 + $0x1], 0  ;;  %s606_s9 = smov 0   ;;  %s608_s10 = smov 0  }
   0x4   :  { %s610_s11 = smov 0   ;;  %s612_s12 = smov 0  }
   0x5   :  { %s614_s13 = smov 0   ;;  %s616_s14 = smov 0  }
   0x6 LB: > { %s388_s15 = sadd.s32 4294967295, %s585_s14   ;;  %s389_s16 = sadd.s32 4294967294, %s585_s14   ;;  %s585_s14 = sphi %s616_s14, %s18_s14   ;;  %s581_s13 = sphi %s614_s13, %s800_s13   ;;  %s577_s12 = sphi %s612_s12, %s799_s12   ;;  %s573_s11 = sphi %s610_s11, %s798_s11   ;;  %s569_s10 = sphi %s608_s10, %s797_s10   ;;  %s565_s9 = sphi %s606_s9, %s796_s9  }
   0x7   : > { %s30_s17 = sadd.s32 1, %s581_s13  ;;  %s39_s18 = sadd.s32 1, %s573_s11 }
   0x8   : > { %p32_p0 = scmp.ge.s32.totalorder %s30_s17, 2  ;;  %p46_p1 = scmp.ne.s32.totalorder %s573_s11, %s569_s10 }
   0x9   : > { %p47_p2 = scmp.eq.s32.totalorder %s585_s14, 0  ;;  %p52_p3 = scmp.ne.s32.totalorder %s569_s10, %s565_s9 }
   0xa   : > { %s802_s17 = smov (%p32_p0, %s30_s17), 0  ;;  %p53_p5 = scmp.eq.s32.totalorder %s388_s15, 0 }
   0xb   : > { %p647_p4 = por %p47_p2, %p46_p1  ;;  %s34_s20 = ssub.s32 %s581_s13, %s802_s17 }
   0xc   : > { %p99_p6 = scmp.eq.s32.totalorder %s388_s15, 1  ;;  %p37_p7 = scmp.eq.s32.totalorder %s34_s20, 0 }
   0xd   : > { %p653_p8 = por %p53_p5, %p52_p3  ;;  %p105_p10 = scmp.eq.s32.totalorder %s389_s16, 1 }
   0xe   : > { %p657_p9 = por %p99_p6, %p46_p1  ;;  %p420_p13 = scmp.lt.s32.totalorder %s585_s14, 2 }
   0xf   : > { %s662_s23 = scalar_select %p37_p7, %s573_s11, %s39_s18  }
  0x10   : > { %s788_s22 = scalar_select %p657_p9, 1, 0 }
  0x11   : > { %p664_p11 = por %p105_p10, %p52_p3  ;;  %s128_s25 = sand.u32 1, %s573_s11  }
  0x12   : > { %s392_s26 = sshll.u32 %s128_s25, 3  ;;  %s406_s27 = sshll.u32 %s581_s13, 7 }
  0x13   : > { %s789_s24 = scalar_select %p664_p11, 1, 0 }
  0x14   : > { %s675_s30 = scalar_lea.hbm %s782_s0, %s406_s27  ;;  %s132_s3 = scalar_lea.vmem [#allocation2], %s392_s26 }
  0x15   : > { %s142_s4 = sshll.u32 %s132_s3, 4  ;;  %p681_p0 = pnand %p420_p13, %p647_p4  ;;  %s677_s4 = int_to_ptr.vmem [resolvable:$true] %s142_s4 }
  0x16   : > { %s129_s6 = scalar_lea.sflag [#allocation3], %s128_s25  ;;  %s473_s7 = scalar_lea.hbm %s675_s30, 128 }
  0x17   : > { %p474_p3 = scmp.ne.s32.totalorder %s675_s30, %s473_s7  ;;  %p475_p5 = pneg %p681_p0 }
  0x18   : > { %s478_s16 = scalar_lea.hbm %s782_s0, 256  ;;  %p479_p4 = scmp.lt.u32.totalorder %s675_s30, %s782_s0 }
  0x19   : > { %p476_p6 = pnand %p475_p5, %p474_p3  ;;  %p480_p10 = scmp.lt.u32.totalorder %s478_s16, %s473_s7 }
  0x1a   : > { %p482_p12 = scmp.lt.u32.totalorder %s473_s7, %s675_s30 }
  0x1b   : > { %p477_p7 = pneg %p476_p6  ;;  %p481_p13 = por %p480_p10, %p479_p4 }
  0x1d   : > { %p483_p1 = por %p482_p12, %p481_p13 }
  0x1f   : > { %p484_p2 = pnand %p483_p1, %p477_p7 }
  0x21   : > { %487 = shalt.err (!%p484_p2)
}
  0x22   : > { %s488_s20 = scalar_lea.vmem %s677_s4, 128  ;;  %s587_s25 = smov [#allocation2]  }
  0x23   : > { %p489_p3 = scmp.ne.s32.totalorder %s677_s4, %s488_s20  ;;  %s493_s26 = sshll.u32 %s587_s25, 4  ;;  %s494_s26 = int_to_ptr.vmem [resolvable:$false] %s493_s26 }
  0x24   : > { %s495_s27 = scalar_lea.vmem %s494_s26, 256  ;;  %p496_p9 = scmp.lt.s32.totalorder %s677_s4, %s494_s26 }
  0x25   : > { %p491_p6 = pnand %p489_p3, %p475_p5  ;;  %p497_p4 = scmp.lt.s32.totalorder %s495_s27, %s488_s20 }
  0x27   : > { %p492_p11 = pneg %p491_p6  ;;  %p498_p10 = por %p497_p4, %p496_p9 }
  0x29   : > { %p499_p12 = pnand %p498_p10, %p492_p11 }
  0x2b   : > { %502 = shalt.err (!%p499_p12)
}
  0x2c   : > { %415 = dma.hbm_to_vmem [thread:$0]  (!%p681_p0), %s675_s30, 128, %s677_s4, %s129_s6  }
  0x2d   : > { %p791_p1 = scmp.lt.s32.totalorder %s585_s14, 3  ;;  %p792_p2 = scmp.ge.s32.totalorder %s585_s14, 1 }
  0x2f   : > { %p148_p5 = pnand %p792_p2, %p791_p1 }
  0x30   : > { %s717_s28 = sand.u32 (!%p148_p5), 1, %s569_s10  }
  0x31   : > { %151 = sbr.rel (%p148_p5) target bundleno = 295 (0x127), region = 28  ;;  %s396_s29 = sshll.u32 (!%p148_p5), %s717_s28, 3 }
  0x32   : > { %s154_s3 = scalar_lea.sflag (!%p148_p5), [#allocation3], %s717_s28  ;;  %s157_s7 = scalar_lea.vmem (!%p148_p5), [#allocation2], %s396_s29 }
  0x38   : > { %556 = dma.done.wait (%p653_p8), %s154_s3, 128  }
  0x39   : > { %558 = vsyncadd (%p653_p8), %s154_s3, 4294967168  ;;  %v588_v0 = vmov 0.0   ;;  %v181_v1 = vld [vmem:[%s157_s7] sm:$0xff]  ;;  %vm188_vm0 = vcmask 1043456   ;;  %vm184_vm1 = vcmask 31744   ;;  %v270_v6 = vlaneseq  ;;  %s397_s21 = sshll.u32 %s717_s28, 1 }
  0x3a   : > { %257 = vmatprep.mubr.f32.mxu0 %v588_v0  ;;  %v183_v2 = vcombine.high %v181_v1, %v181_v1  ;;  %v180_v3 = vld [vmem:[%s783_s1] sm:$0x1]  ;;  %v589_v4 = vmov 1966171168   ;;  %s407_s5 = sshll.u32 %s577_s12, 5  ;;  %s177_s6 = scalar_lea.vmem [#allocation5], %s397_s21 }
  0x3b   : > { %v268_v5 = vunpack.c.l.s4 %v589_v4  ;;  %v271_v8 = vshrl.u32 %v270_v6, 7  ;;  %s304_s8 = sshll.u32 %s177_s6, 4  ;;  %vm284_vm2 = vcmp.lt.s32.totalorder %v270_v6, 256  ;;  %s733_s18 = scalar_lea.hbm %s784_s2, %s407_s5  ;;  %s735_s8 = int_to_ptr.vmem [resolvable:$true] %s304_s8 }
  0x3c   : > { %398 = vmatprep.subr.msk.mxu0 %vm188_vm0, %v183_v2  ;;  %s288_s19 = scalar_lea.sflag [#allocation4], %s717_s28  ;;  %s503_s20 = scalar_lea.vmem %s735_s8, 32 }
  0x3d   : > { %399 = vmatpush1.msk.msra.mxu0 %vm188_vm0, %v181_v1  ;;  %v269_v7 = vunpack.c.0.s8 %v268_v5  ;;  %p504_p8 = scmp.ne.s32.totalorder %s735_s8, %s503_s20  ;;  %p793_p9 = scmp.ne.s32.totalorder %s788_s22, 0 }
  0x3e   : > { %400 = vmatmul.mubr.msk.f32.vlgmr.msra.gmra.mrb[0].mxu0 %vm184_vm1, %v180_v3  ;;  %s590_s12 = smov [#allocation5]  }
  0x3f   : > { %v272_v10 = vsub.s32 %v269_v7, %v271_v8  ;;  %p505_p11 = pnand %p504_p8, %p793_p9  ;;  %s507_s25 = sshll.u32 %s590_s12, 4  ;;  %s508_s25 = int_to_ptr.vmem [resolvable:$false] %s507_s25 }
  0x40   : > { %s509_s26 = scalar_lea.vmem %s508_s25, 64  ;;  %p510_p7 = scmp.lt.s32.totalorder %s735_s8, %s508_s25 }
  0x41   : > { %p506_p0 = pneg %p505_p11  ;;  %p511_p13 = scmp.lt.s32.totalorder %s509_s26, %s503_s20 }
  0x43   : > { %p512_p3 = por %p511_p13, %p510_p7 }
  0x45   : > { %p513_p6 = pnand %p512_p3, %p506_p0 }
 0x111   : > { %v259_v9 = vpop.f32.mrb[0].mxu0 }
 0x112   : > { %v261_v11 = vpop.f32.mrb[1].mxu0 }
 0x113   : > { %v266_v12 = vcombine.low %v259_v9, %v261_v11 }
 0x115   : > { %v273_v13 = vrot.slane %v266_v12, %v272_v10 }
 0x117   : > { %v280_v14 = vrot.slane %v273_v13, %v272_v10 }
 0x119   : > { %286 = vst.msk [vmem:[%s177_s6] sm:$0x3] %vm284_vm2, %v280_v14 }
 0x11a   : > { %516 = shalt.err (!%p513_p6)
}
 0x11b   : > { %s517_s27 = scalar_lea.hbm %s733_s18, 32  ;;  %s521_s3 = scalar_lea.hbm %s784_s2, 64 }
 0x11c   : > { %p518_p4 = scmp.ne.s32.totalorder %s733_s18, %s517_s27  ;;  %p522_p1 = scmp.lt.u32.totalorder %s733_s18, %s784_s2 }
 0x11d   : > { %p523_p2 = scmp.lt.u32.totalorder %s521_s3, %s517_s27  ;;  %p525_p8 = scmp.lt.u32.totalorder %s517_s27, %s733_s18 }
 0x11e   : > { %p519_p10 = pnand %p518_p4, %p793_p9 }
 0x11f   : > { %p524_p5 = por %p523_p2, %p522_p1 }
 0x120   : > { %p520_p12 = pneg %p519_p10 }
 0x121   : > { %p526_p11 = por %p525_p8, %p524_p5 }
 0x123   : > { %p527_p0 = pnand %p526_p11, %p520_p12 }
 0x125   : > { %530 = shalt.err (!%p527_p0)
}
 0x126   : > { %410 = dma.vmem_to_hbm [thread:$0]  (%p793_p9), %s735_s8, 32, %s733_s18, %s288_s19  }
 0x127 PF: > { %s316_s4 = sand.u32 1, %s565_s9   ;;  %p794_p7 = scmp.ne.s32.totalorder %s789_s24, 0 }
 0x128   : > { %p795_p13 = scmp.ge.s32.totalorder %s585_s14, 2  ;;  %s317_s21 = scalar_lea.sflag [#allocation4], %s316_s4 }
 0x12a   : > { %p417_p3 = pnand %p795_p13, %p794_p7 }
 0x12c   : > { %560 = dma.done.wait (!%p417_p3), %s317_s21, 32  }
 0x12d   : > { %562 = vsyncadd (!%p417_p3), %s317_s21, 4294967264  ;;  %s18_s14 = sadd.s32 1, %s585_s14   ;;  %s796_s9 = smov %s569_s10 }
 0x12e   : > { %p15_p6 = scmp.ge.s32.totalorder %s18_s14, 4   ;;  %s797_s10 = smov %s573_s11 }
 0x12f   : > { %s798_s11 = smov %s662_s23  ;;  %s799_s12 = smov %s581_s13 }
 0x130   : > { %s800_s13 = smov %s802_s17  ;;  %17 = sbr.rel (!%p15_p6) target bundleno = 6 (0x6), region = 73 }
 0x137   :  { %322 = vsyncpa [#allocation3], 1 }
 0x138   :  { %324 = vsyncpa [#allocation3 + $0x1], 1 }
 0x139   :  { %325 = vsyncpa [#allocation4], 1 }
 0x13a   :  { %327 = vsyncpa [#allocation4 + $0x1], 1 }

</bundles_post_ra>
